<compile_context>
chip_gen: v5e
topology: v5e:2x2
jax: 0.10.0
libtpu: 0.0.40
codegen_flags: <defaults>
</compile_context>

<pallas_src>
import jax
import jax.numpy as jnp
from jax.experimental import pallas as pl
from jax.experimental.pallas import tpu as pltpu


_VMEM_BUDGET = 32 * 1024 * 1024          # scoped-VMEM request; safe on v5e/v6e/v7x
_TARGET_BLOCK_BYTES = _VMEM_BUDGET // 5  # x-tile target: 4 pipelined buffers
                                         # (2x input + 2x output) + ~20% headroom


def _sublane_multiple(dtype):
    """Native second-to-last-dim packing: 8 rows @32-bit, 16 @16-bit, 32 @8-bit."""
    return max(8, 32 // jnp.dtype(dtype).itemsize)


def _aconc_kernel(x_ref, prm_ref, o_ref):
    x = x_ref[...]                      # (TR, TS)
    prm = prm_ref[...]                  # (TR, 3): [p1-p2, beta*(p1-p2)/6, p2]
    dp = prm[:, 0:1]                    # (TR, 1) broadcast over lanes
    bdp6 = prm[:, 1:2]
    p2 = prm[:, 2:3]
    # F.hardsigmoid(z) = clip(z/6 + 0.5, 0, 1); the /6 is folded into bdp6.
    hs = jnp.clip(bdp6 * x + 0.5, 0.0, 1.0)
    # dpx*hs + p2*x  ==  x * (dp*hs + p2)   (one fewer multiply per element)
    o_ref[...] = x * (dp * hs + p2)


def _pick_tiles(R, S, itemsize, sub, target_bytes=_TARGET_BLOCK_BYTES):
    """Pick (row_tile, lane_tile) giving ~target_bytes of x per block.

    Row tile is a multiple of `sub` (or full R); lane tile is a multiple of
    128 (or full S) so output stores stay unmasked, lane-dense vst.
    """
    row_bytes = S * itemsize
    if sub * row_bytes <= target_bytes:
        # Full spatial rows fit in one block: tile only the row axis.
        tr = max(sub, (target_bytes // row_bytes) // sub * sub)
        if tr >= R:
            tr = R
        else:
            # Prefer >=4 grid steps (DMA/compute overlap + v7x dual-TC split)
            # as long as each block stays >=1 MiB so per-step overhead
            # (~0.35 us + DMA descriptors) is still amortized.
            quarter = (R // 4) // sub * sub
            if quarter >= sub and quarter * row_bytes >= (1 << 20):
                tr = min(tr, quarter)
        return tr, S
    # A single minimal row-group is already too large: keep minimal rows and
    # tile the lane (spatial) axis instead.
    tr = R if R <= sub else sub
    ts = max(128, (target_bytes // (tr * itemsize)) // 128 * 128)
    if ts >= S:
        ts = S
    return tr, ts


def aconc(x, p1, p2, beta, *, row_tile=None, lane_tile=None):
    """AconC forward.

    x:    (N, C, H, W)
    p1:   (1, C, 1, 1)
    p2:   (1, C, 1, 1)
    beta: (1, C, 1, 1)
    returns (N, C, H, W)
    """
    N, C, H, W = x.shape
    R, S = N * C, H * W
    itemsize = jnp.dtype(x.dtype).itemsize
    sub = _sublane_multiple(x.dtype)

    x2d = x.reshape(R, S)

    # Fold per-channel params (cheap, C-sized math), expand to one value per
    # (n, c) row, and pack all three into a single (R, 3) array so each grid
    # step issues one small param DMA instead of three.
    p1_c = p1.reshape(C).astype(x.dtype)
    p2_c = p2.reshape(C).astype(x.dtype)
    beta_c = beta.reshape(C).astype(x.dtype)
    dp_c = p1_c - p2_c
    bdp6_c = beta_c * dp_c * (1.0 / 6.0)
    params = jnp.stack(
        [jnp.tile(dp_c, N), jnp.tile(bdp6_c, N), jnp.tile(p2_c, N)], axis=-1
    )  # (R, 3)

    tr, ts = _pick_tiles(R, S, itemsize, sub)
    if row_tile is not None:
        tr = row_tile
    if lane_tile is not None:
        ts = lane_tile

    grid = (pl.cdiv(R, tr), pl.cdiv(S, ts))

    # Advisory cost: memory-bound elementwise op, ~7 VPU ops per element.
    cost = pl.CostEstimate(
        flops=7 * R * S,
        transcendentals=0,
        bytes_accessed=2 * R * S * itemsize + 3 * R * itemsize,
    )

    out2d = pl.pallas_call(
        _aconc_kernel,
        out_shape=jax.ShapeDtypeStruct((R, S), x.dtype),
        grid=grid,
        in_specs=[
            pl.BlockSpec((tr, ts), lambda i, j: (i, j)),
            pl.BlockSpec((tr, 3), lambda i, j: (i, 0)),
        ],
        out_specs=pl.BlockSpec((tr, ts), lambda i, j: (i, j)),
        compiler_params=pltpu.CompilerParams(
            dimension_semantics=("parallel", "parallel"),
            vmem_limit_bytes=_VMEM_BUDGET,
        ),
        cost_estimate=cost,
    )(x2d, params)

    return out2d.reshape(N, C, H, W)


def aconc_ref(x, p1, p2, beta):
    """Pure-JAX reference for validation (matches the PyTorch forward)."""
    dpx = (p1 - p2) * x
    hs = jnp.clip(beta * dpx / 6.0 + 0.5, 0.0, 1.0)
    return dpx * hs + p2 * x


if __name__ == "__main__":
    key = jax.random.PRNGKey(0)
    k_x, k_p1, k_p2 = jax.random.split(key, 3)

    # Case 1: spec-sized small input (single grid step at this size).
    N, C, H, W = 2, 4, 16, 16
    x = jax.random.normal(k_x, (N, C, H, W), dtype=jnp.float32)
    # Matches nn.Parameter(torch.randn(1, c1, 1, 1)) / torch.ones init.
    p1 = jax.random.normal(k_p1, (1, C, 1, 1), dtype=jnp.float32)
    p2 = jax.random.normal(k_p2, (1, C, 1, 1), dtype=jnp.float32)
    beta = jnp.ones((1, C, 1, 1), dtype=jnp.float32)

    out = aconc(x, p1, p2, beta)
    jax.block_until_ready(out)
    expected = aconc_ref(x, p1, p2, beta)
    assert out.shape == (N, C, H, W)
    assert jnp.allclose(out, expected, atol=1e-5, rtol=1e-5)

    # Case 2: multi-step row grid with a partial trailing row block
    # (R = 24 rows, row tile = 16).
    N2, C2, H2, W2 = 2, 12, 16, 16
    k_x2, k_q1, k_q2 = jax.random.split(jax.random.PRNGKey(1), 3)
    x2 = jax.random.normal(k_x2, (N2, C2, H2, W2), dtype=jnp.float32)
    q1 = jax.random.normal(k_q1, (1, C2, 1, 1), dtype=jnp.float32)
    q2 = jax.random.normal(k_q2, (1, C2, 1, 1), dtype=jnp.float32)
    b2 = jnp.ones((1, C2, 1, 1), dtype=jnp.float32)

    out2 = aconc(x2, q1, q2, b2, row_tile=16)
    jax.block_until_ready(out2)
    assert jnp.allclose(out2, aconc_ref(x2, q1, q2, b2), atol=1e-5, rtol=1e-5)

    # Case 3: exercise the 2-D (row, lane) grid, including a partial trailing
    # lane block (S = 16*33 = 528, lane tile = 256 -> grid (2, 3)).
    N3, C3, H3, W3 = 2, 8, 16, 33
    k_x3, k_r1, k_r2, k_b3 = jax.random.split(jax.random.PRNGKey(2), 4)
    x3 = jax.random.normal(k_x3, (N3, C3, H3, W3), dtype=jnp.float32)
    r1 = jax.random.normal(k_r1, (1, C3, 1, 1), dtype=jnp.float32)
    r2 = jax.random.normal(k_r2, (1, C3, 1, 1), dtype=jnp.float32)
    b3 = jax.random.normal(k_b3, (1, C3, 1, 1), dtype=jnp.float32) + 1.0

    out3 = aconc(x3, r1, r2, b3, row_tile=8, lane_tile=256)
    jax.block_until_ready(out3)
    assert jnp.allclose(out3, aconc_ref(x3, r1, r2, b3), atol=1e-5, rtol=1e-5)

    print("KERNEL_OK")
</pallas_src>

<mosaic_0001>
module attributes {stable_mosaic.version = 11 : i64} {
  func.func @_aconc_kernel(%arg0: i32, %arg1: i32, %arg2: memref<8x256xf32, #tpu.memory_space<vmem>>, %arg3: memref<8x3xf32, #tpu.memory_space<vmem>>, %arg4: memref<8x256xf32, #tpu.memory_space<vmem>>) attributes {dimension_semantics = [#tpu.dimension_semantics<parallel>, #tpu.dimension_semantics<parallel>], iteration_bounds = array<i64: 1, 1>, scalar_prefetch = 0 : i64, scratch_operands = 0 : i64, tpu.core_type = #tpu.core_type<tc>, window_params = [{transform_indices = @transform_0, window_bounds = array<i64: 8, 256>}, {transform_indices = @transform_1, window_bounds = array<i64: 8, 3>}, {transform_indices = @transform_2, window_bounds = array<i64: 8, 256>}]} {
    %c0 = arith.constant 0 : index
    %c0_0 = arith.constant 0 : index
    %0 = vector.load %arg2[%c0, %c0_0] : memref<8x256xf32, #tpu.memory_space<vmem>>, vector<8x256xf32>
    %c0_1 = arith.constant 0 : index
    %c0_2 = arith.constant 0 : index
    %1 = vector.load %arg3[%c0_1, %c0_2] : memref<8x3xf32, #tpu.memory_space<vmem>>, vector<8x3xf32>
    %2 = vector.extract_strided_slice %1 {offsets = [0, 0], sizes = [8, 1], strides = [1, 1]} : vector<8x3xf32> to vector<8x1xf32>
    %3 = vector.extract_strided_slice %1 {offsets = [0, 1], sizes = [8, 1], strides = [1, 1]} : vector<8x3xf32> to vector<8x1xf32>
    %4 = vector.extract_strided_slice %1 {offsets = [0, 2], sizes = [8, 1], strides = [1, 1]} : vector<8x3xf32> to vector<8x1xf32>
    %5 = vector.broadcast %3 : vector<8x1xf32> to vector<8x256xf32>
    %6 = arith.mulf %5, %0 : vector<8x256xf32>
    %cst = arith.constant 5.000000e-01 : f32
    %7 = vector.broadcast %cst : f32 to vector<8x256xf32>
    %8 = arith.addf %6, %7 : vector<8x256xf32>
    %cst_3 = arith.constant 0.000000e+00 : f32
    %cst_4 = arith.constant 1.000000e+00 : f32
    %9 = vector.broadcast %cst_3 : f32 to vector<8x256xf32>
    %10 = arith.maximumf %9, %8 : vector<8x256xf32>
    %11 = vector.broadcast %cst_4 : f32 to vector<8x256xf32>
    %12 = arith.minimumf %11, %10 : vector<8x256xf32>
    %13 = vector.broadcast %2 : vector<8x1xf32> to vector<8x256xf32>
    %14 = arith.mulf %13, %12 : vector<8x256xf32>
    %15 = vector.broadcast %4 : vector<8x1xf32> to vector<8x256xf32>
    %16 = arith.addf %14, %15 : vector<8x256xf32>
    %17 = arith.mulf %0, %16 : vector<8x256xf32>
    %c0_5 = arith.constant 0 : index
    %c0_6 = arith.constant 0 : index
    %18 = vector.load %arg4[%c0_5, %c0_6] : memref<8x256xf32, #tpu.memory_space<vmem>>, vector<8x256xf32>
    tpu.vector_store %arg4[%c0_5, %c0_6], %17 {strides = array<i32>} : memref<8x256xf32, #tpu.memory_space<vmem>>, vector<8x256xf32>,
    return
  }
  func.func @transform_0(%arg0: i32, %arg1: i32) -> (i32, i32) {
    %c0_i32 = arith.constant 0 : i32
    return %arg0, %arg1 : i32, i32
  }
  func.func @transform_1(%arg0: i32, %arg1: i32) -> (i32, i32) {
    %c0_i32 = arith.constant 0 : i32
    %c0_i32_0 = arith.constant 0 : i32
    return %arg0, %c0_i32 : i32, i32
  }
  func.func @transform_2(%arg0: i32, %arg1: i32) -> (i32, i32) {
    %c0_i32 = arith.constant 0 : i32
    return %arg0, %arg1 : i32, i32
  }
}

</mosaic_0001>

<bundles_post_ra>
// kernel: tpu_custom_call.1
= control target key start
LH: loop header
LB: loop body
LE: loop exit
PB: predicated region body
PF: predicated region fallthrough
CT: control target
= control target key end

     0   :  { %7 = vsyncpa [#allocation3], 0  ;;  %s165_s0 = inlined_call_operand.hbm [shape: f32[8,256], index: 0, kind: input, shape index: {}]   ;;  %s166_s1 = inlined_call_operand.vmem [shape: f32[8,3], index: 1, kind: input, shape index: {}]   ;;  %s167_s2 = inlined_call_operand.hbm [shape: f32[8,256], index: 2, kind: output, shape index: {}]  }
   0x1   :  { %8 = vsyncpa [#allocation4], 0  ;;  %s14_s11 = sshll.u32 %s165_s0, 4  ;;  %s136_s12 = smov [#allocation2]   ;;  %s15_s11 = int_to_ptr.hbm [resolvable:$true] %s14_s11 }
   0x2   :  { %s16_s13 = sshll.u32 %s136_s12, 4  ;;  %s17_s13 = int_to_ptr.vmem [resolvable:$true] %s16_s13 }
   0x3   :  { %19 = dma.hbm_to_vmem [thread:$0]  %s15_s11, 256, %s17_s13, [#allocation3]  }
   0x4   :  { %132 = dma.done.wait [#allocation3], 256  }
   0x5   :  { %133 = vsyncadd [#allocation3], 4294967040  ;;  %v137_v0 = vmov 1   ;;  %v138_v1 = vmov 2   ;;  %v28_v2 = vld [vmem:[%s166_s1] sm:$0xff]  ;;  %v139_v3 = vmov 0  }
   0x6   :  { %80 = vset.pattern.permute.xlu0 %v137_v0  ;;  %82 = vset.pattern.permute.xlu1 %v138_v1  ;;  %v26_v4 = vld [vmem:[#allocation2] sm:$0xff]  ;;  %v27_v5 = vld [vmem:[#allocation2 + $0x8] sm:$0xff]  ;;  %s140_s0 = smov [#allocation5]   ;;  %s65_s18 = sshll.u32 %s167_s2, 4  ;;  %s66_s18 = int_to_ptr.hbm [resolvable:$true] %s65_s18 }
   0x7   :  { %31 = vperm.xlu0 %80, %v28_v2   ;;  %49 = vperm.xlu1 %82, %v28_v2   ;;  %s63_s1 = sshll.u32 %s140_s0, 4  ;;  %s64_s1 = int_to_ptr.vmem [resolvable:$true] %s63_s1 }
   0xf   :  { %81 = vset.pattern.permute.xlu0 %v139_v3 }
  0x10   :  { %43 = vperm.xlu0 %81, %v28_v2  }
  0x18   :  { %83 = vset.pattern.permute.xlu0 %v138_v1 }
  0x79   :  { %v32_v6 = vpop.permute.xlu0 %31  ;;  %v50_v16 = vpop.permute.xlu1 %49 }
  0x7a   :  { %v34_v7 = vmul.f32 %v32_v6, %v26_v4  ;;  %v35_v8 = vmul.f32 %v32_v6, %v27_v5 }
  0x7c   :  { %v36_v9 = vadd.f32 0.5, %v34_v7  ;;  %v37_v10 = vadd.f32 0.5, %v35_v8 }
  0x7e   :  { %v38_v11 = vmax.f32 %v36_v9, 0.0  ;;  %v39_v12 = vmax.f32 %v37_v10, 0.0 }
  0x80   :  { %v40_v13 = vmin.f32 %v38_v11, 1.0  ;;  %v41_v14 = vmin.f32 %v39_v12, 1.0 }
  0x82   :  { %v44_v15 = vpop.permute.xlu0 %43 }
  0x83   :  { %v46_v17 = vmul.f32 %v44_v15, %v40_v13  ;;  %v47_v18 = vmul.f32 %v44_v15, %v41_v14 }
  0x85   :  { %v52_v19 = vadd.f32 %v50_v16, %v46_v17  ;;  %v53_v20 = vadd.f32 %v50_v16, %v47_v18 }
  0x87   :  { %v54_v21 = vmul.f32 %v52_v19, %v26_v4  ;;  %v55_v22 = vmul.f32 %v53_v20, %v27_v5 }
  0x89   :  { %56 = vst [vmem:[#allocation5] sm:$0xff] %v54_v21 }
  0x8a   :  { %57 = vst [vmem:[#allocation5 + $0x8] sm:$0xff] %v55_v22 }
  0x8b   :  { %68 = dma.vmem_to_hbm [thread:$0]  %s64_s1, 256, %s66_s18, [#allocation4]  }
  0x8c   :  { %134 = dma.done.wait [#allocation4], 256  }
  0x8d   :  { %135 = vsyncadd [#allocation4], 4294967040 }
  0x8e   :  { %73 = vsyncpa [#allocation3], 1 }
  0x8f   :  { %74 = vsyncpa [#allocation4], 1 }

</bundles_post_ra>
